<compile_context>
chip_gen: v7x
topology: tpu7x:2x2x1
jax: 0.10.0
libtpu: 0.0.40
codegen_flags: <defaults>
</compile_context>

<pallas_src>
import jax
import jax.numpy as jnp
from jax.experimental import pallas as pl
from jax.experimental.pallas import tpu as pltpu  # noqa: F401  (TPU backend import)

N_LAYERS = 10
FEAT = 10


def mymodule_kernel(x_ref, wc_ref, bc_ref, o_ref):
    # x: (B, 10); wc: (10, 10, 10) as [layer, in, out]; bc: (10, 10) as [layer, out].
    x = x_ref[...].astype(jnp.float32)
    wc = wc_ref[...]                     # already f32, pre-folded, pre-transposed
    bc = bc_ref[...]
    # Static Python loop (unrolled at trace time): x = x @ W_comb[i] + b_comb[i]
    for i in range(N_LAYERS):
        x = jnp.dot(x, wc[i], preferred_element_type=jnp.float32) + bc[i]
    o_ref[...] = x.astype(o_ref.dtype)


def mymodule_forward(x, weights, biases):
    """x: (B, 10); weights: (10, 10, 10) PyTorch layout [layer, out, in]; biases: (10, 10)."""
    B, F = x.shape
    assert F == FEAT and weights.shape == (N_LAYERS, FEAT, FEAT) and biases.shape == (N_LAYERS, FEAT)

    # One-time fold in the wrapper (f32): L[i//2](x) + L[i](x) == x @ (W[i//2]+W[i]).T + (b[i//2]+b[i])
    idx_half = jnp.arange(N_LAYERS, dtype=jnp.int32) // 2
    w32 = weights.astype(jnp.float32)
    b32 = biases.astype(jnp.float32)
    w_comb = w32[idx_half] + w32                       # (10, out, in)
    w_comb = jnp.transpose(w_comb, (0, 2, 1))          # (10, in, out) -> no .T in kernel
    b_comb = b32[idx_half] + b32                       # (10, out)

    return pl.pallas_call(
        mymodule_kernel,
        out_shape=jax.ShapeDtypeStruct((B, FEAT), x.dtype),
        # Single invocation; full-array blocks live in VMEM.
        in_specs=[
            pl.BlockSpec((B, FEAT), lambda: (0, 0)),
            pl.BlockSpec((N_LAYERS, FEAT, FEAT), lambda: (0, 0, 0)),
            pl.BlockSpec((N_LAYERS, FEAT), lambda: (0, 0)),
        ],
        out_specs=pl.BlockSpec((B, FEAT), lambda: (0, 0)),
    )(x, w_comb, b_comb)


def reference_forward(x, weights, biases):
    # Exact PyTorch semantics: x = L[i//2](x) + L[i](x), L(x) = x @ W.T + b
    for i in range(N_LAYERS):
        j = i // 2
        x = (x @ weights[j].T + biases[j]) + (x @ weights[i].T + biases[i])
    return x


if __name__ == "__main__":
    key = jax.random.PRNGKey(0)
    kx, kw, kb = jax.random.split(key, 3)

    # Deterministic params mimicking PyTorch nn.Linear default init:
    # uniform(-1/sqrt(in_features), 1/sqrt(in_features))
    bound = 1.0 / jnp.sqrt(jnp.float32(FEAT))
    weights = jax.random.uniform(kw, (N_LAYERS, FEAT, FEAT), jnp.float32,
                                 minval=-bound, maxval=bound)
    biases = jax.random.uniform(kb, (N_LAYERS, FEAT), jnp.float32,
                                minval=-bound, maxval=bound)

    B = 8
    x = jax.random.normal(kx, (B, FEAT), jnp.float32)

    out = mymodule_forward(x, weights, biases)
    out = jax.block_until_ready(out)

    ref = reference_forward(x, weights, biases)
    assert out.shape == (B, FEAT)
    assert jnp.allclose(out, ref, atol=1e-4, rtol=1e-4), "mismatch vs reference"
    print("KERNEL_OK")
</pallas_src>

<mosaic_0001>
module attributes {stable_mosaic.version = 11 : i64} {
  func.func @mymodule_kernel(%arg0: memref<8x10xf32, #tpu.memory_space<vmem>>, %arg1: memref<10x10x10xf32, #tpu.memory_space<vmem>>, %arg2: memref<10x10xf32, #tpu.memory_space<vmem>>, %arg3: memref<8x10xf32, #tpu.memory_space<vmem>>) attributes {dimension_semantics = [], scalar_prefetch = 0 : i64, scratch_operands = 0 : i64, tpu.core_type = #tpu.core_type<tc>} {
    %c0 = arith.constant 0 : index
    %c0_0 = arith.constant 0 : index
    %0 = vector.load %arg0[%c0, %c0_0] : memref<8x10xf32, #tpu.memory_space<vmem>>, vector<8x10xf32>
    %c0_1 = arith.constant 0 : index
    %c0_2 = arith.constant 0 : index
    %c0_3 = arith.constant 0 : index
    %1 = vector.load %arg1[%c0_1, %c0_2, %c0_3] : memref<10x10x10xf32, #tpu.memory_space<vmem>>, vector<10x10x10xf32>
    %c0_4 = arith.constant 0 : index
    %c0_5 = arith.constant 0 : index
    %2 = vector.load %arg2[%c0_4, %c0_5] : memref<10x10xf32, #tpu.memory_space<vmem>>, vector<10x10xf32>
    %3 = vector.extract_strided_slice %1 {offsets = [0, 0, 0], sizes = [1, 10, 10], strides = [1, 1, 1]} : vector<10x10x10xf32> to vector<1x10x10xf32>
    %4 = vector.shape_cast %3 : vector<1x10x10xf32> to vector<10x10xf32>
    %cst = arith.constant dense<0.000000e+00> : vector<8x10xf32>
    %5 = tpu.matmul %0, %4, %cst {dimension_numbers = #tpu.dot_dimension_numbers<[1], [0], [0], [1], [0, 0, 1, 1], [], []>} : vector<8x10xf32>, vector<10x10xf32>, vector<8x10xf32> -> vector<8x10xf32>
    %6 = vector.extract_strided_slice %2 {offsets = [0, 0], sizes = [1, 10], strides = [1, 1]} : vector<10x10xf32> to vector<1x10xf32>
    %7 = vector.shape_cast %6 : vector<1x10xf32> to vector<10xf32>
    %8 = vector.shape_cast %7 : vector<10xf32> to vector<1x10xf32>
    %9 = vector.broadcast %8 : vector<1x10xf32> to vector<8x10xf32>
    %10 = arith.addf %5, %9 : vector<8x10xf32>
    %11 = vector.extract_strided_slice %1 {offsets = [1, 0, 0], sizes = [1, 10, 10], strides = [1, 1, 1]} : vector<10x10x10xf32> to vector<1x10x10xf32>
    %12 = vector.shape_cast %11 : vector<1x10x10xf32> to vector<10x10xf32>
    %cst_6 = arith.constant dense<0.000000e+00> : vector<8x10xf32>
    %13 = tpu.matmul %10, %12, %cst_6 {dimension_numbers = #tpu.dot_dimension_numbers<[1], [0], [0], [1], [0, 0, 1, 1], [], []>} : vector<8x10xf32>, vector<10x10xf32>, vector<8x10xf32> -> vector<8x10xf32>
    %14 = vector.extract_strided_slice %2 {offsets = [1, 0], sizes = [1, 10], strides = [1, 1]} : vector<10x10xf32> to vector<1x10xf32>
    %15 = vector.shape_cast %14 : vector<1x10xf32> to vector<10xf32>
    %16 = vector.shape_cast %15 : vector<10xf32> to vector<1x10xf32>
    %17 = vector.broadcast %16 : vector<1x10xf32> to vector<8x10xf32>
    %18 = arith.addf %13, %17 : vector<8x10xf32>
    %19 = vector.extract_strided_slice %1 {offsets = [2, 0, 0], sizes = [1, 10, 10], strides = [1, 1, 1]} : vector<10x10x10xf32> to vector<1x10x10xf32>
    %20 = vector.shape_cast %19 : vector<1x10x10xf32> to vector<10x10xf32>
    %cst_7 = arith.constant dense<0.000000e+00> : vector<8x10xf32>
    %21 = tpu.matmul %18, %20, %cst_7 {dimension_numbers = #tpu.dot_dimension_numbers<[1], [0], [0], [1], [0, 0, 1, 1], [], []>} : vector<8x10xf32>, vector<10x10xf32>, vector<8x10xf32> -> vector<8x10xf32>
    %22 = vector.extract_strided_slice %2 {offsets = [2, 0], sizes = [1, 10], strides = [1, 1]} : vector<10x10xf32> to vector<1x10xf32>
    %23 = vector.shape_cast %22 : vector<1x10xf32> to vector<10xf32>
    %24 = vector.shape_cast %23 : vector<10xf32> to vector<1x10xf32>
    %25 = vector.broadcast %24 : vector<1x10xf32> to vector<8x10xf32>
    %26 = arith.addf %21, %25 : vector<8x10xf32>
    %27 = vector.extract_strided_slice %1 {offsets = [3, 0, 0], sizes = [1, 10, 10], strides = [1, 1, 1]} : vector<10x10x10xf32> to vector<1x10x10xf32>
    %28 = vector.shape_cast %27 : vector<1x10x10xf32> to vector<10x10xf32>
    %cst_8 = arith.constant dense<0.000000e+00> : vector<8x10xf32>
    %29 = tpu.matmul %26, %28, %cst_8 {dimension_numbers = #tpu.dot_dimension_numbers<[1], [0], [0], [1], [0, 0, 1, 1], [], []>} : vector<8x10xf32>, vector<10x10xf32>, vector<8x10xf32> -> vector<8x10xf32>
    %30 = vector.extract_strided_slice %2 {offsets = [3, 0], sizes = [1, 10], strides = [1, 1]} : vector<10x10xf32> to vector<1x10xf32>
    %31 = vector.shape_cast %30 : vector<1x10xf32> to vector<10xf32>
    %32 = vector.shape_cast %31 : vector<10xf32> to vector<1x10xf32>
    %33 = vector.broadcast %32 : vector<1x10xf32> to vector<8x10xf32>
    %34 = arith.addf %29, %33 : vector<8x10xf32>
    %35 = vector.extract_strided_slice %1 {offsets = [4, 0, 0], sizes = [1, 10, 10], strides = [1, 1, 1]} : vector<10x10x10xf32> to vector<1x10x10xf32>
    %36 = vector.shape_cast %35 : vector<1x10x10xf32> to vector<10x10xf32>
    %cst_9 = arith.constant dense<0.000000e+00> : vector<8x10xf32>
    %37 = tpu.matmul %34, %36, %cst_9 {dimension_numbers = #tpu.dot_dimension_numbers<[1], [0], [0], [1], [0, 0, 1, 1], [], []>} : vector<8x10xf32>, vector<10x10xf32>, vector<8x10xf32> -> vector<8x10xf32>
    %38 = vector.extract_strided_slice %2 {offsets = [4, 0], sizes = [1, 10], strides = [1, 1]} : vector<10x10xf32> to vector<1x10xf32>
    %39 = vector.shape_cast %38 : vector<1x10xf32> to vector<10xf32>
    %40 = vector.shape_cast %39 : vector<10xf32> to vector<1x10xf32>
    %41 = vector.broadcast %40 : vector<1x10xf32> to vector<8x10xf32>
    %42 = arith.addf %37, %41 : vector<8x10xf32>
    %43 = vector.extract_strided_slice %1 {offsets = [5, 0, 0], sizes = [1, 10, 10], strides = [1, 1, 1]} : vector<10x10x10xf32> to vector<1x10x10xf32>
    %44 = vector.shape_cast %43 : vector<1x10x10xf32> to vector<10x10xf32>
    %cst_10 = arith.constant dense<0.000000e+00> : vector<8x10xf32>
    %45 = tpu.matmul %42, %44, %cst_10 {dimension_numbers = #tpu.dot_dimension_numbers<[1], [0], [0], [1], [0, 0, 1, 1], [], []>} : vector<8x10xf32>, vector<10x10xf32>, vector<8x10xf32> -> vector<8x10xf32>
    %46 = vector.extract_strided_slice %2 {offsets = [5, 0], sizes = [1, 10], strides = [1, 1]} : vector<10x10xf32> to vector<1x10xf32>
    %47 = vector.shape_cast %46 : vector<1x10xf32> to vector<10xf32>
    %48 = vector.shape_cast %47 : vector<10xf32> to vector<1x10xf32>
    %49 = vector.broadcast %48 : vector<1x10xf32> to vector<8x10xf32>
    %50 = arith.addf %45, %49 : vector<8x10xf32>
    %51 = vector.extract_strided_slice %1 {offsets = [6, 0, 0], sizes = [1, 10, 10], strides = [1, 1, 1]} : vector<10x10x10xf32> to vector<1x10x10xf32>
    %52 = vector.shape_cast %51 : vector<1x10x10xf32> to vector<10x10xf32>
    %cst_11 = arith.constant dense<0.000000e+00> : vector<8x10xf32>
    %53 = tpu.matmul %50, %52, %cst_11 {dimension_numbers = #tpu.dot_dimension_numbers<[1], [0], [0], [1], [0, 0, 1, 1], [], []>} : vector<8x10xf32>, vector<10x10xf32>, vector<8x10xf32> -> vector<8x10xf32>
    %54 = vector.extract_strided_slice %2 {offsets = [6, 0], sizes = [1, 10], strides = [1, 1]} : vector<10x10xf32> to vector<1x10xf32>
    %55 = vector.shape_cast %54 : vector<1x10xf32> to vector<10xf32>
    %56 = vector.shape_cast %55 : vector<10xf32> to vector<1x10xf32>
    %57 = vector.broadcast %56 : vector<1x10xf32> to vector<8x10xf32>
    %58 = arith.addf %53, %57 : vector<8x10xf32>
    %59 = vector.extract_strided_slice %1 {offsets = [7, 0, 0], sizes = [1, 10, 10], strides = [1, 1, 1]} : vector<10x10x10xf32> to vector<1x10x10xf32>
    %60 = vector.shape_cast %59 : vector<1x10x10xf32> to vector<10x10xf32>
    %cst_12 = arith.constant dense<0.000000e+00> : vector<8x10xf32>
    %61 = tpu.matmul %58, %60, %cst_12 {dimension_numbers = #tpu.dot_dimension_numbers<[1], [0], [0], [1], [0, 0, 1, 1], [], []>} : vector<8x10xf32>, vector<10x10xf32>, vector<8x10xf32> -> vector<8x10xf32>
    %62 = vector.extract_strided_slice %2 {offsets = [7, 0], sizes = [1, 10], strides = [1, 1]} : vector<10x10xf32> to vector<1x10xf32>
    %63 = vector.shape_cast %62 : vector<1x10xf32> to vector<10xf32>
    %64 = vector.shape_cast %63 : vector<10xf32> to vector<1x10xf32>
    %65 = vector.broadcast %64 : vector<1x10xf32> to vector<8x10xf32>
    %66 = arith.addf %61, %65 : vector<8x10xf32>
    %67 = vector.extract_strided_slice %1 {offsets = [8, 0, 0], sizes = [1, 10, 10], strides = [1, 1, 1]} : vector<10x10x10xf32> to vector<1x10x10xf32>
    %68 = vector.shape_cast %67 : vector<1x10x10xf32> to vector<10x10xf32>
    %cst_13 = arith.constant dense<0.000000e+00> : vector<8x10xf32>
    %69 = tpu.matmul %66, %68, %cst_13 {dimension_numbers = #tpu.dot_dimension_numbers<[1], [0], [0], [1], [0, 0, 1, 1], [], []>} : vector<8x10xf32>, vector<10x10xf32>, vector<8x10xf32> -> vector<8x10xf32>
    %70 = vector.extract_strided_slice %2 {offsets = [8, 0], sizes = [1, 10], strides = [1, 1]} : vector<10x10xf32> to vector<1x10xf32>
    %71 = vector.shape_cast %70 : vector<1x10xf32> to vector<10xf32>
    %72 = vector.shape_cast %71 : vector<10xf32> to vector<1x10xf32>
    %73 = vector.broadcast %72 : vector<1x10xf32> to vector<8x10xf32>
    %74 = arith.addf %69, %73 : vector<8x10xf32>
    %75 = vector.extract_strided_slice %1 {offsets = [9, 0, 0], sizes = [1, 10, 10], strides = [1, 1, 1]} : vector<10x10x10xf32> to vector<1x10x10xf32>
    %76 = vector.shape_cast %75 : vector<1x10x10xf32> to vector<10x10xf32>
    %cst_14 = arith.constant dense<0.000000e+00> : vector<8x10xf32>
    %77 = tpu.matmul %74, %76, %cst_14 {dimension_numbers = #tpu.dot_dimension_numbers<[1], [0], [0], [1], [0, 0, 1, 1], [], []>} : vector<8x10xf32>, vector<10x10xf32>, vector<8x10xf32> -> vector<8x10xf32>
    %78 = vector.extract_strided_slice %2 {offsets = [9, 0], sizes = [1, 10], strides = [1, 1]} : vector<10x10xf32> to vector<1x10xf32>
    %79 = vector.shape_cast %78 : vector<1x10xf32> to vector<10xf32>
    %80 = vector.shape_cast %79 : vector<10xf32> to vector<1x10xf32>
    %81 = vector.broadcast %80 : vector<1x10xf32> to vector<8x10xf32>
    %82 = arith.addf %77, %81 : vector<8x10xf32>
    %c0_15 = arith.constant 0 : index
    %c0_16 = arith.constant 0 : index
    %83 = vector.load %arg3[%c0_15, %c0_16] : memref<8x10xf32, #tpu.memory_space<vmem>>, vector<8x10xf32>
    tpu.vector_store %arg3[%c0_15, %c0_16], %82 {strides = array<i32>} : memref<8x10xf32, #tpu.memory_space<vmem>>, vector<8x10xf32>,
    return
  }
}

</mosaic_0001>

<bundles_post_ra>
// kernel: tpu_custom_call.1
= control target key start
LH: loop header
LB: loop body
LE: loop exit
PB: predicated region body
PF: predicated region fallthrough
CT: control target
= control target key end

     0   :  { %8 = vsyncpa [#allocation3], 0  ;;  %s1337_s0 = inlined_call_operand.hbm [shape: f32[8,10], index: 0, kind: input, shape index: {}]   ;;  %s1338_s1 = inlined_call_operand.hbm [shape: f32[10,10,10], index: 1, kind: input, shape index: {}]   ;;  %s1339_s2 = inlined_call_operand.hbm [shape: f32[10,10], index: 2, kind: input, shape index: {}]   ;;  %s1340_s3 = inlined_call_operand.hbm [shape: f32[8,10], index: 3, kind: output, shape index: {}]  }
   0x1   :  { %9 = vsyncpa [#allocation6], 0 }
   0x2   :  { %10 = vsyncpa [#allocation4], 0  ;;  %s1160_s12 = smov [#allocation5]   ;;  %s1066_s16 = scalar_lea.hbm %s1338_s1, 2560 }
   0x3   :  { %s26_s13 = sshll.u32 %s1160_s12, 4  ;;  %p1067_p0 = scmp.ne.s32.totalorder %s1338_s1, %s1066_s16  ;;  %s27_s13 = int_to_ptr.vmem [resolvable:$true] %s26_s13 }
   0x4   :  { %p1070_p1 = scmp.lt.u32.totalorder %s1066_s16, %s1338_s1 }
   0x6   :  { %p1072_p2 = pnand %p1070_p1, %p1067_p0 }
   0x8   :  { %1075 = shalt.err (!%p1072_p2)
}
   0x9   :  { %s1076_s21 = scalar_lea.vmem %s27_s13, 2560  ;;  %p1081_p4 = scmp.lt.s32.totalorder %s27_s13, %s27_s13 }
   0xa   :  { %p1077_p3 = scmp.ne.s32.totalorder %s27_s13, %s1076_s21  ;;  %p1082_p5 = scmp.lt.s32.totalorder %s1076_s21, %s1076_s21 }
   0xc   :  { %p1083_p6 = por %p1082_p5, %p1081_p4 }
   0xe   :  { %p1084_p7 = pnand %p1083_p6, %p1077_p3 }
  0x10   :  { %1087 = shalt.err (!%p1084_p7)
}
  0x11   :  { %s1161_s22 = smov 128   ;;  %s1162_s23 = smov 8  }
  0x12   :  { %32 = dma.hbm_to_vmem [thread:$0]  %s1338_s1, 2560, %s27_s13, [#allocation6], %s1161_s22, %s1161_s22, %s1162_s23  }
  0x13   :  { %s1163_s26 = smov [#allocation2]   ;;  %s1164_s28 = smov [#allocation7]  }
  0x14   :  { %s17_s27 = sshll.u32 %s1163_s26, 4  ;;  %s38_s29 = sshll.u32 %s1164_s28, 4  ;;  %s18_s27 = int_to_ptr.vmem [resolvable:$true] %s17_s27  ;;  %s39_s29 = int_to_ptr.vmem [resolvable:$true] %s38_s29 }
  0x15   :  { %s1088_s5 = scalar_lea.hbm %s1337_s0, 128 }
  0x16   :  { %p1089_p8 = scmp.ne.s32.totalorder %s1337_s0, %s1088_s5  ;;  %p1092_p9 = scmp.lt.u32.totalorder %s1088_s5, %s1337_s0 }
  0x18   :  { %p1094_p10 = pnand %p1092_p9, %p1089_p8 }
  0x1a   :  { %1097 = shalt.err (!%p1094_p10)
}
  0x1b   :  { %s1098_s1 = scalar_lea.vmem %s18_s27, 128  ;;  %p1103_p12 = scmp.lt.s32.totalorder %s18_s27, %s18_s27 }
  0x1c   :  { %p1099_p11 = scmp.ne.s32.totalorder %s18_s27, %s1098_s1  ;;  %p1104_p13 = scmp.lt.s32.totalorder %s1098_s1, %s1098_s1 }
  0x1e   :  { %p1105_p0 = por %p1104_p13, %p1103_p12 }
  0x20   :  { %p1106_p1 = pnand %p1105_p0, %p1099_p11 }
  0x22   :  { %1109 = shalt.err (!%p1106_p1)
}
  0x23   :  { %20 = dma.hbm_to_vmem [thread:$0]  %s1337_s0, 128, %s18_s27, [#allocation3]  }
  0x24   :  { %s1110_s14 = scalar_lea.hbm %s1339_s2, 256 }
  0x25   :  { %p1111_p2 = scmp.ne.s32.totalorder %s1339_s2, %s1110_s14  ;;  %p1114_p3 = scmp.lt.u32.totalorder %s1110_s14, %s1339_s2 }
  0x27   :  { %p1116_p4 = pnand %p1114_p3, %p1111_p2 }
  0x29   :  { %1119 = shalt.err (!%p1116_p4)
}
  0x2a   :  { %s1120_s19 = scalar_lea.vmem %s39_s29, 256  ;;  %p1125_p6 = scmp.lt.s32.totalorder %s39_s29, %s39_s29 }
  0x2b   :  { %p1121_p5 = scmp.ne.s32.totalorder %s39_s29, %s1120_s19  ;;  %p1126_p7 = scmp.lt.s32.totalorder %s1120_s19, %s1120_s19 }
  0x2d   :  { %p1127_p8 = por %p1126_p7, %p1125_p6 }
  0x2f   :  { %p1128_p9 = pnand %p1127_p8, %p1121_p5 }
  0x31   :  { %1131 = shalt.err (!%p1128_p9)
}
  0x32   :  { %44 = dma.hbm_to_vmem [thread:$0]  %s1339_s2, 256, %s39_s29, [#allocation6], %s1161_s22, %s1161_s22, %s1162_s23  }
  0x33   :  { %1154 = dma.done.wait [#allocation3], 128  }
  0x34   :  { %1155 = vsyncadd [#allocation3], 4294967168 }
  0x35   :  { %1156 = dma.done.wait [#allocation6], 2816  }
  0x36   :  { %1157 = vsyncadd [#allocation6], 4294964480  ;;  %v1165_v0 = vmov 0.0|0.0   ;;  %vm1166_vm0 = vmmov 0   ;;  %v1167_v1 = vmov 0.0   ;;  %vm85_vm1 = vcmask 1041408  }
  0x37   :  { %1016 = vmatprep.subr.bf16.mxu0 %v1165_v0  ;;  %1020 = vmatprep.subr.bf16.mxu1 %v1165_v0  ;;  %v55_v2 = vld [vmem:[#allocation5] sm:$0xff]  ;;  %v56_v3 = vld [vmem:[#allocation5 + $0x8] sm:$0x3]  ;;  %vm1168_vm2 = vmmov 1   ;;  %v54_v6 = vld [vmem:[#allocation2] sm:$0xff]  ;;  %vm81_vm4 = vcmask 80896   ;;  %v77_v13 = vlaneseq }
  0x38   :  { %950 = vmatprep.mubr.msk.f32.mxu0 %vm1166_vm0, %v1167_v1  ;;  %957 = vmatprep.mubr.msk.f32.mxu1 %vm1166_vm0, %v1167_v1  ;;  %vm1238_vm3 = vmpackc.low %vm85_vm1, %vm1168_vm2  ;;  %v1017_v5 = vpack.c.bf16 %v56_v3, %v55_v2  ;;  %v57_v7 = vld [vmem:[#allocation5 + $0x10] sm:$0xff]  ;;  %v58_v8 = vld [vmem:[#allocation5 + $0x18] sm:$0x3]  ;;  %s1169_s2 = smov [#allocation8]  }
  0x39   :  { %v1021_v9 = vpack.c.bf16 %v58_v8, %v57_v7  ;;  %v59_v10 = vld [vmem:[#allocation5 + $0x20] sm:$0xff]  ;;  %v60_v11 = vld [vmem:[#allocation5 + $0x28] sm:$0x3]  ;;  %v1254_v14 = vshrl.u32 %v77_v13, 7  ;;  %v61_v21 = vld [vmem:[#allocation5 + $0x30] sm:$0xff]  ;;  %s886_s21 = sshll.u32 %s1169_s2, 4  ;;  %s887_s21 = int_to_ptr.vmem [resolvable:$true] %s886_s21 }
  0x3a   :  { %1019 = vmatpush3.bf16.msk.msra.mxu0 %vm1238_vm3, %v1017_v5  ;;  %v1025_v12 = vpack.c.bf16 %v60_v11, %v59_v10  ;;  %v1257_v16 = vld [vmem:[#allocation7] sm:$0xff]  ;;  %v62_v22 = vld [vmem:[#allocation5 + $0x38] sm:$0x3]  ;;  %v64_v30 = vld [vmem:[#allocation5 + $0x48] sm:$0x3]  ;;  %s1132_s22 = scalar_lea.vmem %s887_s21, 128  ;;  %p1137_p11 = scmp.lt.s32.totalorder %s887_s21, %s887_s21 }
  0x3b   :  { %1024 = vmatprep.subr.bf16.mxu0 %v1165_v0  ;;  %1023 = vmatpush3.bf16.msk.msra.mxu1 %vm1238_vm3, %v1021_v9  ;;  %v79_v15 = vsub.s32 0, %v1254_v14  ;;  %v1029_v23 = vpack.c.bf16 %v62_v22, %v61_v21  ;;  %v161_v24 = vsub.s32 1, %v1254_v14  ;;  %v63_v29 = vld [vmem:[#allocation5 + $0x40] sm:$0xff]  ;;  %v241_v32 = vsub.s32 2, %v1254_v14  ;;  %v65_v37 = vld [vmem:[#allocation5 + $0x50] sm:$0xff]  ;;  %p1133_p10 = scmp.ne.s32.totalorder %s887_s21, %s1132_s22  ;;  %p1138_p12 = scmp.lt.s32.totalorder %s1132_s22, %s1132_s22 }
  0x3c   :  { %1028 = vmatprep.subr.bf16.mxu1 %v1165_v0  ;;  %v1033_v31 = vpack.c.bf16 %v64_v30, %v63_v29  ;;  %v66_v38 = vld [vmem:[#allocation5 + $0x58] sm:$0x3]  ;;  %v321_v40 = vsub.s32 3, %v1254_v14  ;;  %v67_v45 = vld [vmem:[#allocation5 + $0x60] sm:$0xff]  ;;  %v68_v46 = vld [vmem:[#allocation5 + $0x68] sm:$0x3] }
  0x3d   :  { %951 = vmatmul.mubr.msk.f32.vlgmr.msra.gmra.mrb[0].mxu0 %vm81_vm4, %v54_v6  ;;  %v80_v17 = vrot.slane %v1257_v16, %v79_v15  ;;  %v162_v25 = vrot.slane %v1257_v16, %v161_v24  ;;  %v242_v33 = vrot.slane %v1257_v16, %v241_v32  ;;  %v1037_v39 = vpack.c.bf16 %v66_v38, %v65_v37  ;;  %v69_v53 = vld [vmem:[#allocation5 + $0x70] sm:$0xff]  ;;  %v70_v54 = vld [vmem:[#allocation5 + $0x78] sm:$0x3]  ;;  %v71_v61 = vld [vmem:[#allocation5 + $0x80] sm:$0xff]  ;;  %p1139_p13 = por %p1138_p12, %p1137_p11 }
  0x3e   :  { %964 = vmatprep.mubr.msk.f32.mxu0 %vm1166_vm0, %v1167_v1  ;;  %1027 = vmatpush3.bf16.msk.msra.mxu0 %vm1238_vm3, %v1025_v12  ;;  %v322_v41 = vrot.slane %v1257_v16, %v321_v40  ;;  %v1041_v47 = vpack.c.bf16 %v68_v46, %v67_v45  ;;  %v401_v48 = vsub.s32 4, %v1254_v14  ;;  %v1045_v55 = vpack.c.bf16 %v70_v54, %v69_v53  ;;  %v72_v62 = vld [vmem:[#allocation5 + $0x88] sm:$0x3]  ;;  %v73_v7 = vld [vmem:[#allocation5 + $0x90] sm:$0xff]  ;;  %v74_v8 = vld [vmem:[#allocation5 + $0x98] sm:$0x3] }
  0x3f   :  { %1032 = vmatprep.subr.bf16.mxu0 %v1165_v0  ;;  %v481_v56 = vsub.s32 5, %v1254_v14  ;;  %v1049_v63 = vpack.c.bf16 %v72_v62, %v71_v61  ;;  %v1053_v9 = vpack.c.bf16 %v74_v8, %v73_v7  ;;  %v641_v10 = vsub.s32 7, %v1254_v14  ;;  %p1140_p0 = pnand %p1139_p13, %p1133_p10 }
  0x40   :  { %v402_v49 = vrot.slane %v1257_v16, %v401_v48 }
  0x41   :  { %v482_v57 = vrot.slane %v1257_v16, %v481_v56  ;;  %v642_v11 = vrot.slane %v1257_v16, %v641_v10 }
 0x110   :  { %v155_v18 = vpop.f32.mrb[0].mxu0 }
 0x111   :  { %v156_v19 = vadd.f32 %v155_v18, %v80_v17  ;;  %v952_v20 = vpop.f32.mrb[1].mxu0  ;;  %v76_v18 = vld [vmem:[#allocation7 + $0x8] sm:$0x3] }
 0x112   :  { %v802_v4 = vrot.slane %v76_v18, %v161_v24 }
 0x113   :  { %958 = vmatmul.mubr.msk.f32.vlgmr.msra.gmra.mrb[0].mxu1 %vm81_vm4, %v156_v19  ;;  %v722_v19 = vrot.slane %v76_v18, %v79_v15 }
 0x114   :  { %971 = vmatprep.mubr.msk.f32.mxu1 %vm1166_vm0, %v1167_v1  ;;  %1031 = vmatpush3.bf16.msk.msra.mxu1 %vm1238_vm3, %v1029_v23 }
 0x115   :  { %1036 = vmatprep.subr.bf16.mxu1 %v1165_v0 }
 0x1e6   :  { %v235_v26 = vpop.f32.mrb[0].mxu1 }
 0x1e7   :  { %v236_v27 = vadd.f32 %v235_v26, %v162_v25  ;;  %v959_v28 = vpop.f32.mrb[1].mxu1 }
 0x1e9   :  { %965 = vmatmul.mubr.msk.f32.vlgmr.msra.gmra.mrb[2].mxu0 %vm81_vm4, %v236_v27 }
 0x1ea   :  { %978 = vmatprep.mubr.msk.f32.mxu0 %vm1166_vm0, %v1167_v1  ;;  %1035 = vmatpush3.bf16.msk.msra.mxu0 %vm1238_vm3, %v1033_v31 }
 0x1eb   :  { %1040 = vmatprep.subr.bf16.mxu0 %v1165_v0 }
 0x2bc   :  { %v315_v34 = vpop.f32.mrb[2].mxu0 }
 0x2bd   :  { %v316_v35 = vadd.f32 %v315_v34, %v242_v33  ;;  %v966_v36 = vpop.f32.mrb[3].mxu0 }
 0x2bf   :  { %972 = vmatmul.mubr.msk.f32.vlgmr.msra.gmra.mrb[2].mxu1 %vm81_vm4, %v316_v35 }
 0x2c0   :  { %985 = vmatprep.mubr.msk.f32.mxu1 %vm1166_vm0, %v1167_v1  ;;  %1039 = vmatpush3.bf16.msk.msra.mxu1 %vm1238_vm3, %v1037_v39 }
 0x2c1   :  { %1044 = vmatprep.subr.bf16.mxu1 %v1165_v0 }
 0x392   :  { %v395_v42 = vpop.f32.mrb[2].mxu1 }
 0x393   :  { %v396_v43 = vadd.f32 %v395_v42, %v322_v41  ;;  %v973_v44 = vpop.f32.mrb[3].mxu1 }
 0x395   :  { %979 = vmatmul.mubr.msk.f32.vlgmr.msra.gmra.mrb[4].mxu0 %vm81_vm4, %v396_v43 }
 0x396   :  { %992 = vmatprep.mubr.msk.f32.mxu0 %vm1166_vm0, %v1167_v1  ;;  %1043 = vmatpush3.bf16.msk.msra.mxu0 %vm1238_vm3, %v1041_v47 }
 0x397   :  { %1048 = vmatprep.subr.bf16.mxu0 %v1165_v0 }
 0x468   :  { %v475_v50 = vpop.f32.mrb[4].mxu0 }
 0x469   :  { %v476_v51 = vadd.f32 %v475_v50, %v402_v49  ;;  %v980_v52 = vpop.f32.mrb[5].mxu0 }
 0x46b   :  { %986 = vmatmul.mubr.msk.f32.vlgmr.msra.gmra.mrb[4].mxu1 %vm81_vm4, %v476_v51 }
 0x46c   :  { %999 = vmatprep.mubr.msk.f32.mxu1 %vm1166_vm0, %v1167_v1  ;;  %1047 = vmatpush3.bf16.msk.msra.mxu1 %vm1238_vm3, %v1045_v55 }
 0x46d   :  { %1052 = vmatprep.subr.bf16.mxu1 %v1165_v0  ;;  %v561_v0 = vsub.s32 6, %v1254_v14 }
 0x46f   :  { %v562_v2 = vrot.slane %v1257_v16, %v561_v0 }
 0x53e   :  { %v555_v58 = vpop.f32.mrb[4].mxu1 }
 0x53f   :  { %v556_v59 = vadd.f32 %v555_v58, %v482_v57  ;;  %v987_v60 = vpop.f32.mrb[5].mxu1 }
 0x541   :  { %993 = vmatmul.mubr.msk.f32.vlgmr.msra.gmra.mrb[6].mxu0 %vm81_vm4, %v556_v59 }
 0x542   :  { %1006 = vmatprep.mubr.msk.f32.mxu0 %vm1166_vm0, %v1167_v1  ;;  %1051 = vmatpush3.bf16.msk.msra.mxu0 %vm1238_vm3, %v1049_v63 }
 0x614   :  { %v635_v3 = vpop.f32.mrb[6].mxu0 }
 0x615   :  { %v636_v5 = vadd.f32 %v635_v3, %v562_v2  ;;  %v994_v6 = vpop.f32.mrb[7].mxu0 }
 0x617   :  { %1000 = vmatmul.mubr.msk.f32.vlgmr.msra.gmra.mrb[6].mxu1 %vm81_vm4, %v636_v5 }
 0x618   :  { %1013 = vmatprep.mubr.msk.f32.mxu1 %vm1166_vm0, %v1167_v1  ;;  %1055 = vmatpush3.bf16.msk.msra.mxu1 %vm1238_vm3, %v1053_v9 }
 0x6ea   :  { %v715_v12 = vpop.f32.mrb[6].mxu1 }
 0x6eb   :  { %v716_v13 = vadd.f32 %v715_v12, %v642_v11  ;;  %v1001_v17 = vpop.f32.mrb[7].mxu1 }
 0x6ed   :  { %1007 = vmatmul.mubr.msk.f32.vlgmr.msra.gmra.mrb[8].mxu0 %vm81_vm4, %v716_v13 }
 0x7c0   :  { %v795_v1 = vpop.f32.mrb[8].mxu0 }
 0x7c1   :  { %v796_v20 = vadd.f32 %v795_v1, %v722_v19  ;;  %v1008_v21 = vpop.f32.mrb[9].mxu0 }
 0x7c3   :  { %1014 = vmatmul.mubr.msk.f32.vlgmr.msra.gmra.mrb[8].mxu1 %vm81_vm4, %v796_v20 }
 0x896   :  { %v875_v16 = vpop.f32.mrb[8].mxu1 }
 0x897   :  { %v876_v22 = vadd.f32 %v875_v16, %v802_v4  ;;  %v1015_v23 = vpop.f32.mrb[9].mxu1 }
 0x899   :  { %879 = vst.msk [vmem:[#allocation8] sm:$0xff] %vm81_vm4, %v876_v22 }
 0x89a   :  { %1143 = shalt.err (!%p1140_p0)
}
 0x89b   :  { %s1144_s25 = scalar_lea.hbm %s1340_s3, 128 }
 0x89c   :  { %p1145_p1 = scmp.ne.s32.totalorder %s1340_s3, %s1144_s25  ;;  %p1148_p2 = scmp.lt.u32.totalorder %s1144_s25, %s1340_s3 }
 0x89e   :  { %p1150_p3 = pnand %p1148_p2, %p1145_p1 }
 0x8a0   :  { %1153 = shalt.err (!%p1150_p3)
}
 0x8a1   :  { %889 = dma.vmem_to_hbm [thread:$0]  %s887_s21, 128, %s1340_s3, [#allocation4]  }
 0x8a2   :  { %1158 = dma.done.wait [#allocation4], 128  }
 0x8a3   :  { %1159 = vsyncadd [#allocation4], 4294967168 }
 0x8a4   :  { %893 = vsyncpa [#allocation3], 1 }
 0x8a5   :  { %894 = vsyncpa [#allocation6], 1 }
 0x8a6   :  { %895 = vsyncpa [#allocation4], 1 }

</bundles_post_ra>
